<compile_context>
chip_gen: v7x
topology: tpu7x:2x2x1
jax: 0.10.0
libtpu: 0.0.40
codegen_flags: <defaults>
</compile_context>

<pallas_src>
import math

import numpy as np
import jax
import jax.numpy as jnp
from jax.experimental import pallas as pl
from jax.experimental.pallas import tpu as pltpu

LN_EPS = 1e-5


def _encoder_kernel(x_ref, w_ref, s_ref, b_ref, o_ref):
    # x_ref: [TM, K]              streamed activation row-block (patches)
    # w_ref: [K, N]               folded weight  W' = diag(gamma) @ W   (resident)
    # s_ref: [1, N]  f32          column sums of W' (as seen by the MXU) (resident)
    # b_ref: [1, N]  f32          folded bias beta @ W + b              (resident)
    # o_ref: [TM, N]
    #
    # Ragged last row-block: Pallas leaves out-of-bounds rows of the tile
    # uninitialized.  Every output row below depends only on its own input row
    # (LN stats are per-row; matmul rows are independent) and ragged output
    # rows are never written back, so the garbage rows are benign.  Do NOT add
    # any cross-row reduction here without masking those rows first.
    x = x_ref[...].astype(jnp.float32)
    mean = jnp.mean(x, axis=-1, keepdims=True)            # [TM, 1]
    cen = x - mean
    var = jnp.mean(cen * cen, axis=-1, keepdims=True)     # [TM, 1]
    inv = jax.lax.rsqrt(var + LN_EPS)                     # EUP, effectively free

    # MXU: raw x cast once to the weight dtype (bf16 by default), f32 accumulate.
    z = jnp.dot(x_ref[...].astype(w_ref.dtype), w_ref[...],
                preferred_element_type=jnp.float32)       # [TM, N]

    y = inv * (z - mean * s_ref[...]) + b_ref[...]
    o_ref[...] = y.astype(o_ref.dtype)


def _pick_row_tile(M, K, N, x_bytes, w_bytes, o_bytes, row_tile):
    """Pick the activation row-tile.

    - As large as possible (amortize per-step pipeline overhead), up to
      `row_tile`.
    - Once M is big enough to be worth splitting, guarantee >= 2 grid blocks so
      `dimension_semantics=("parallel",)` can shard across the two v7x
      TensorCores.
    - Keep the (multi-)buffered footprint comfortably inside scoped VMEM
      (v7x physical VMEM is only 64 MiB).
    """
    row_tile = max(8, (row_tile // 8) * 8)
    if M <= 256 and M <= row_tile:
        tm = M                                   # single full-dim block is legal
    else:
        half = (((M + 1) // 2) + 7) // 8 * 8     # round_up(ceil(M/2), 8)
        tm = min(row_tile, half)

    def footprint(t):
        return (3 * t * K * x_bytes              # streamed x (up to 3 buffers)
                + 2 * t * N * o_bytes            # streamed out (double buffered)
                + 2 * K * N * w_bytes            # resident weight (double buffered)
                + 4 * N * 4)                     # colsum + bias

    while tm > 64 and footprint(tm) > 48 * (1 << 20):
        tm = max(64, ((tm // 2) + 7) // 8 * 8)
    return tm, footprint(tm)


def ecg_encoder_forward(x, gamma, beta, w_kn, b, patch_size, *,
                        matmul_dtype=jnp.bfloat16, row_tile=1024,
                        out_dtype=None):
    """x: [B, S, E] -> [B, num_patch, d_hid].

    gamma/beta: [K] LayerNorm affine params, w_kn: [K, d_hid] (= torch
    Linear.weight.T), b: [d_hid]; all in PyTorch's channel-major K ordering
    (k = e*patch_size + p).  Wrap this function in jax.jit in production so the
    pad/reshape/parameter-folding glue fuses with the surrounding graph.
    """
    B, S, E = x.shape
    P = patch_size
    num_patch = -(-S // P)
    pad = num_patch * P - S
    if pad:
        # The appended zero time-steps deliberately enter the tail patch's
        # LayerNorm statistics: this matches the pad-then-unfold PyTorch
        # semantics (and the reference below).
        # TODO(synk): fold this pad into the kernel (mask the tail patch with a
        # broadcasted_iota-vs-S compare) to avoid one extra HBM pass over x when
        # S % patch_size != 0.  Doing so requires an in-kernel patchify (strided
        # sublane loads or a relayouting reshape); kept out of this revision to
        # guarantee a clean lowering.  The fast path (pad == 0) never pays it.
        x = jnp.pad(x, ((0, 0), (0, pad), (0, 0)))

    K = E * P
    N = w_kn.shape[1]
    M = B * num_patch
    if out_dtype is None:
        out_dtype = x.dtype

    # nn.Unfold produces channel-major features (k_torch = e*P + p); a plain
    # reshape of x produces time-major features (k_time = p*E + e).  LayerNorm
    # stats are permutation-invariant, so the *parameters* are permuted once
    # (O(K*N), negligible) instead of transposing the activation slab.
    perm = (np.arange(P)[:, None] + P * np.arange(E)[None, :]).reshape(-1)

    gamma_t = gamma.astype(jnp.float32)[perm]
    beta_t = beta.astype(jnp.float32)[perm]
    w_time = w_kn.astype(jnp.float32)[perm, :]

    # Fold LN affine + projection (exact):  y = inv*(x@W' - mean*colsum(W')) + bias'
    w_fold = (gamma_t[:, None] * w_time).astype(matmul_dtype)        # [K, N]
    # colsum over the weights the MXU actually sees (post-cast) so the
    # (z - mean*colsum) cancellation is consistent with the matmul.
    col_sum = jnp.sum(w_fold.astype(jnp.float32), axis=0, keepdims=True)   # [1, N]
    bias_f = (beta_t @ w_time + b.astype(jnp.float32)).reshape(1, N)       # [1, N]

    # Zero-copy patchify: x[b, l*P + p, e] -> x2[b*num_patch + l, p*E + e].
    x2 = x.reshape(M, K)

    x_bytes = jnp.dtype(x.dtype).itemsize
    w_bytes = jnp.dtype(matmul_dtype).itemsize
    o_bytes = jnp.dtype(out_dtype).itemsize
    TM, footprint = _pick_row_tile(M, K, N, x_bytes, w_bytes, o_bytes, row_tile)
    n_blocks = -(-M // TM)

    # Deeper buffering on the streamed activations only pays on long grids;
    # resident operands (constant index_map) are left at the default.
    if n_blocks >= 3:
        x_spec = pl.BlockSpec((TM, K), lambda i: (i, 0),
                              pipeline_mode=pl.Buffered(3))
    else:
        x_spec = pl.BlockSpec((TM, K), lambda i: (i, 0))

    vmem_limit = None
    if footprint > 24 * (1 << 20):
        vmem_limit = min(int(footprint * 1.25) + (2 << 20), 64 * (1 << 20))

    out = pl.pallas_call(
        _encoder_kernel,
        out_shape=jax.ShapeDtypeStruct((M, N), out_dtype),
        grid_spec=pltpu.PrefetchScalarGridSpec(
            num_scalar_prefetch=0,
            grid=(n_blocks,),
            in_specs=[
                x_spec,                                    # streamed activations
                pl.BlockSpec((K, N), lambda i: (0, 0)),    # folded weight (resident)
                pl.BlockSpec((1, N), lambda i: (0, 0)),    # colsum(W')    (resident)
                pl.BlockSpec((1, N), lambda i: (0, 0)),    # folded bias   (resident)
            ],
            out_specs=pl.BlockSpec((TM, N), lambda i: (i, 0)),
        ),
        compiler_params=pltpu.CompilerParams(
            dimension_semantics=("parallel",),
            vmem_limit_bytes=vmem_limit,
        ),
        cost_estimate=pl.CostEstimate(
            flops=2 * M * K * N,
            transcendentals=M,                         # one rsqrt per patch row
            bytes_accessed=(M * K * x_bytes + M * N * o_bytes
                            + K * N * w_bytes + 2 * N * 4),
        ),
    )(x2, w_fold, col_sum, bias_f)

    return out.reshape(B, num_patch, N)


def reference_forward(x, gamma, beta, w_kn, b, patch_size):
    """Pure-JAX mirror of the PyTorch forward (torch channel-major K order)."""
    B, S, E = x.shape
    P = patch_size
    num_patch = -(-S // P)
    pad = num_patch * P - S
    if pad:
        x = jnp.pad(x, ((0, 0), (0, pad), (0, 0)))
    xp = (x.reshape(B, num_patch, P, E)
          .transpose(0, 1, 3, 2)
          .reshape(B, num_patch, E * P))
    mean = jnp.mean(xp, axis=-1, keepdims=True)
    var = jnp.mean((xp - mean) ** 2, axis=-1, keepdims=True)
    xn = (xp - mean) / jnp.sqrt(var + LN_EPS) * gamma + beta
    return xn @ w_kn + b


if __name__ == "__main__":
    patch_size = 4
    feat_size = 4        # E
    d_hid = 32
    K = patch_size * feat_size

    key = jax.random.PRNGKey(0)
    kg, kb, kw, kbias, kx1, kx2, kx3 = jax.random.split(key, 7)

    # Deterministic parameters (shapes from the module's __init__), stored in
    # torch's channel-major K ordering; weight as [K, d_hid] (= weight.T).
    gamma = 1.0 + 0.1 * jax.random.normal(kg, (K,), dtype=jnp.float32)
    beta = 0.1 * jax.random.normal(kb, (K,), dtype=jnp.float32)
    bound = 1.0 / math.sqrt(K)
    w_kn = jax.random.uniform(kw, (K, d_hid), minval=-bound, maxval=bound,
                              dtype=jnp.float32)
    b = jax.random.uniform(kbias, (d_hid,), minval=-bound, maxval=bound,
                           dtype=jnp.float32)

    # Tolerances: the folded formulation changes summation order and the MXU's
    # f32 path may itself be bf16-pass based, so the f32 check is ~5e-3 rather
    # than 1e-6; any *logic* error (permutation/folding/LN) is orders of
    # magnitude larger than that.
    F32_TOL = dict(atol=5e-3, rtol=5e-3)
    BF16_TOL = dict(atol=2e-2, rtol=2e-2)

    # --- Test 1: S % patch_size == 0 (zero-copy fast path), single block ----
    x1 = jax.random.normal(kx1, (2, 64, feat_size), dtype=jnp.float32)
    ref1 = reference_forward(x1, gamma, beta, w_kn, b, patch_size)
    out1_bf = jax.block_until_ready(
        ecg_encoder_forward(x1, gamma, beta, w_kn, b, patch_size))      # default bf16 MXU
    out1_f32 = jax.block_until_ready(
        ecg_encoder_forward(x1, gamma, beta, w_kn, b, patch_size,
                            matmul_dtype=jnp.float32))
    assert out1_bf.shape == (2, 16, d_hid), out1_bf.shape
    assert jnp.allclose(out1_f32, ref1, **F32_TOL), "f32 mismatch (test 1)"
    assert jnp.allclose(out1_bf, ref1, **BF16_TOL), "bf16 mismatch (test 1)"

    # --- Test 2: S % patch_size != 0 (tail-padding path) --------------------
    x2 = jax.random.normal(kx2, (2, 14, feat_size), dtype=jnp.float32)
    ref2 = reference_forward(x2, gamma, beta, w_kn, b, patch_size)
    out2 = jax.block_until_ready(
        ecg_encoder_forward(x2, gamma, beta, w_kn, b, patch_size,
                            matmul_dtype=jnp.float32))
    assert out2.shape == (2, 4, d_hid), out2.shape
    assert jnp.allclose(out2, ref2, **F32_TOL), "mismatch (test 2)"

    # --- Test 3: multi-block 'parallel' grid with a ragged last row block ---
    x3 = jax.random.normal(kx3, (3, 20, feat_size), dtype=jnp.float32)  # M = 15
    ref3 = reference_forward(x3, gamma, beta, w_kn, b, patch_size)
    out3 = jax.block_until_ready(
        ecg_encoder_forward(x3, gamma, beta, w_kn, b, patch_size,
                            matmul_dtype=jnp.float32, row_tile=8))
    assert out3.shape == (3, 5, d_hid), out3.shape
    assert jnp.allclose(out3, ref3, **F32_TOL), "mismatch (test 3)"

    print("KERNEL_OK")
</pallas_src>

<mosaic_0001>
module attributes {stable_mosaic.version = 11 : i64} {
  func.func @_encoder_kernel(%arg0: i32, %arg1: memref<32x16xf32, #tpu.memory_space<vmem>>, %arg2: memref<16x32xbf16, #tpu.memory_space<vmem>>, %arg3: memref<1x32xf32, #tpu.memory_space<vmem>>, %arg4: memref<1x32xf32, #tpu.memory_space<vmem>>, %arg5: memref<32x32xf32, #tpu.memory_space<vmem>>) attributes {dimension_semantics = [#tpu.dimension_semantics<parallel>], iteration_bounds = array<i64: 1>, scalar_prefetch = 0 : i64, scratch_operands = 0 : i64, tpu.core_type = #tpu.core_type<tc>, window_params = [{transform_indices = @transform_0, window_bounds = array<i64: 32, 16>}, {pipeline_mode = #tpu.pipeline_mode<synchronous>, transform_indices = @transform_1, window_bounds = array<i64: 16, 32>}, {pipeline_mode = #tpu.pipeline_mode<synchronous>, transform_indices = @transform_2, window_bounds = array<i64: 1, 32>}, {pipeline_mode = #tpu.pipeline_mode<synchronous>, transform_indices = @transform_3, window_bounds = array<i64: 1, 32>}, {transform_indices = @transform_4, window_bounds = array<i64: 32, 32>}]} {
    %c0 = arith.constant 0 : index
    %c0_0 = arith.constant 0 : index
    %0 = vector.load %arg1[%c0, %c0_0] : memref<32x16xf32, #tpu.memory_space<vmem>>, vector<32x16xf32>
    %cst = arith.constant dense<0.000000e+00> : vector<32xf32>
    %1 = vector.multi_reduction <add>, %0, %cst [1] : vector<32x16xf32> to vector<32xf32>
    %2 = vector.shape_cast %1 : vector<32xf32> to vector<32x1xf32>
    %cst_1 = arith.constant 1.600000e+01 : f32
    %3 = vector.broadcast %cst_1 : f32 to vector<32x1xf32>
    %4 = arith.divf %2, %3 : vector<32x1xf32>
    %5 = vector.broadcast %4 : vector<32x1xf32> to vector<32x16xf32>
    %6 = arith.subf %0, %5 : vector<32x16xf32>
    %7 = arith.mulf %6, %6 : vector<32x16xf32>
    %cst_2 = arith.constant dense<0.000000e+00> : vector<32xf32>
    %8 = vector.multi_reduction <add>, %7, %cst_2 [1] : vector<32x16xf32> to vector<32xf32>
    %9 = vector.shape_cast %8 : vector<32xf32> to vector<32x1xf32>
    %cst_3 = arith.constant 1.600000e+01 : f32
    %10 = vector.broadcast %cst_3 : f32 to vector<32x1xf32>
    %11 = arith.divf %9, %10 : vector<32x1xf32>
    %cst_4 = arith.constant 9.99999974E-6 : f32
    %12 = vector.broadcast %cst_4 : f32 to vector<32x1xf32>
    %13 = arith.addf %11, %12 : vector<32x1xf32>
    %14 = math.rsqrt %13 : vector<32x1xf32>
    %c0_5 = arith.constant 0 : index
    %c0_6 = arith.constant 0 : index
    %15 = vector.load %arg1[%c0_5, %c0_6] : memref<32x16xf32, #tpu.memory_space<vmem>>, vector<32x16xf32>
    %16 = arith.truncf %15 : vector<32x16xf32> to vector<32x16xbf16>
    %c0_7 = arith.constant 0 : index
    %c0_8 = arith.constant 0 : index
    %17 = vector.load %arg2[%c0_7, %c0_8] : memref<16x32xbf16, #tpu.memory_space<vmem>>, vector<16x32xbf16>
    %cst_9 = arith.constant dense<0.000000e+00> : vector<32x32xf32>
    %18 = tpu.matmul %16, %17, %cst_9 {dimension_numbers = #tpu.dot_dimension_numbers<[1], [0], [0], [1], [0, 0, 1, 1], [], []>} : vector<32x16xbf16>, vector<16x32xbf16>, vector<32x32xf32> -> vector<32x32xf32>
    %c0_10 = arith.constant 0 : index
    %c0_11 = arith.constant 0 : index
    %19 = vector.load %arg3[%c0_10, %c0_11] : memref<1x32xf32, #tpu.memory_space<vmem>>, vector<1x32xf32>
    %20 = vector.broadcast %4 : vector<32x1xf32> to vector<32x32xf32>
    %21 = vector.broadcast %19 : vector<1x32xf32> to vector<32x32xf32>
    %22 = arith.mulf %20, %21 : vector<32x32xf32>
    %23 = arith.subf %18, %22 : vector<32x32xf32>
    %24 = vector.broadcast %14 : vector<32x1xf32> to vector<32x32xf32>
    %25 = arith.mulf %24, %23 : vector<32x32xf32>
    %c0_12 = arith.constant 0 : index
    %c0_13 = arith.constant 0 : index
    %26 = vector.load %arg4[%c0_12, %c0_13] : memref<1x32xf32, #tpu.memory_space<vmem>>, vector<1x32xf32>
    %27 = vector.broadcast %26 : vector<1x32xf32> to vector<32x32xf32>
    %28 = arith.addf %25, %27 : vector<32x32xf32>
    %c0_14 = arith.constant 0 : index
    %c0_15 = arith.constant 0 : index
    %29 = vector.load %arg5[%c0_14, %c0_15] : memref<32x32xf32, #tpu.memory_space<vmem>>, vector<32x32xf32>
    tpu.vector_store %arg5[%c0_14, %c0_15], %28 {strides = array<i32>} : memref<32x32xf32, #tpu.memory_space<vmem>>, vector<32x32xf32>,
    return
  }
  func.func @transform_0(%arg0: i32) -> (i32, i32) {
    %c0_i32 = arith.constant 0 : i32
    %c0_i32_0 = arith.constant 0 : i32
    return %arg0, %c0_i32 : i32, i32
  }
  func.func @transform_1(%arg0: i32) -> (i32, i32) {
    %c0_i32 = arith.constant 0 : i32
    %c0_i32_0 = arith.constant 0 : i32
    %c0_i32_1 = arith.constant 0 : i32
    return %c0_i32, %c0_i32_0 : i32, i32
  }
  func.func @transform_2(%arg0: i32) -> (i32, i32) {
    %c0_i32 = arith.constant 0 : i32
    %c0_i32_0 = arith.constant 0 : i32
    %c0_i32_1 = arith.constant 0 : i32
    return %c0_i32, %c0_i32_0 : i32, i32
  }
  func.func @transform_3(%arg0: i32) -> (i32, i32) {
    %c0_i32 = arith.constant 0 : i32
    %c0_i32_0 = arith.constant 0 : i32
    %c0_i32_1 = arith.constant 0 : i32
    return %c0_i32, %c0_i32_0 : i32, i32
  }
  func.func @transform_4(%arg0: i32) -> (i32, i32) {
    %c0_i32 = arith.constant 0 : i32
    %c0_i32_0 = arith.constant 0 : i32
    return %arg0, %c0_i32 : i32, i32
  }
}

</mosaic_0001>

<bundles_post_ra>
// kernel: tpu_custom_call.1
= control target key start
LH: loop header
LB: loop body
LE: loop exit
PB: predicated region body
PF: predicated region fallthrough
CT: control target
= control target key end

     0   :  { %vm23_vm0 = vcmask 130048   ;;  %s314_s0 = inlined_call_operand.vmem [shape: f32[32,16], index: 0, kind: input, shape index: {}]   ;;  %s315_s1 = inlined_call_operand.vmem [shape: bf16[16,32], index: 1, kind: input, shape index: {}]   ;;  %s316_s2 = inlined_call_operand.vmem [shape: f32[1,32], index: 2, kind: input, shape index: {}]   ;;  %s317_s3 = inlined_call_operand.vmem [shape: f32[1,32], index: 3, kind: input, shape index: {}]   ;;  %s318_s4 = inlined_call_operand.hbm [shape: f32[32,32], index: 4, kind: output, shape index: {}]  }
   0x1   :  { %v19_v0 = vld [vmem:[%s314_s0] sm:$0xff]  ;;  %v21_v3 = vld [vmem:[%s314_s0 + $0x10] sm:$0xff]  ;;  %v22_v4 = vld [vmem:[%s314_s0 + $0x18] sm:$0xff] }
   0x2   :  { %v24_v1 = vsel %vm23_vm0, %v19_v0, 0.0  ;;  %v206_v2 = vld [vmem:[%s315_s1] sm:$0xff]   ;;  %v30_v5 = vsel %vm23_vm0, %v21_v3, 0.0  ;;  %v20_v6 = vld [vmem:[%s314_s0 + $0x8] sm:$0xff] }
   0x3   :  { %25 = vadd.xlane.f32.xlu0 %v24_v1 }
   0x4   :  { %9 = vsyncpa [#allocation3], 0  ;;  %197 = vmatprep.subr.bf16.mxu0 %v206_v2  ;;  %v74_v7 = vpack.c.bf16 %v22_v4, %v21_v3  ;;  %31 = vadd.xlane.f32.xlu1 %v30_v5  ;;  %v73_v8 = vpack.c.bf16 %v20_v6, %v19_v0  ;;  %v27_v9 = vsel %vm23_vm0, %v20_v6, 0.0  ;;  %v33_v10 = vsel %vm23_vm0, %v22_v4, 0.0  ;;  %v192_v31 = vld [vmem:[%s316_s2] ss:$0 sm:$0xff] }
   0x5   :  { %198 = vmatpush3.bf16.msra.mxu0 %v206_v2  ;;  %v193_v57 = vld [vmem:[%s317_s3] ss:$0 sm:$0xff]  ;;  %vm168_vm1 = vcmask 261120   ;;  %s239_s26 = smov [#allocation2]  }
   0x6   :  { %199 = vmatprep.mubr.msk.bf16.mxu0 %vm23_vm0, %v73_v8  ;;  %s178_s27 = sshll.u32 %s239_s26, 4  ;;  %s179_s27 = int_to_ptr.vmem [resolvable:$true] %s178_s27 }
   0x7   :  { %28 = vadd.xlane.f32.xlu0 %v27_v9  ;;  %s215_s3 = scalar_lea.vmem %s179_s27, 512  ;;  %p220_p1 = scmp.lt.s32.totalorder %s179_s27, %s179_s27 }
   0x8   :  { %200 = vmatmul.mubr.msk.bf16.vlgmr.msra.gmra.mrb[0].mxu0 %vm23_vm0, %v74_v7  ;;  %34 = vadd.xlane.f32.xlu1 %v33_v10  ;;  %p216_p0 = scmp.ne.s32.totalorder %s179_s27, %s215_s3  ;;  %p221_p2 = scmp.lt.s32.totalorder %s215_s3, %s215_s3 }
   0xa   :  { %p222_p3 = por %p221_p2, %p220_p1 }
   0xc   :  { %p223_p4 = pnand %p222_p3, %p216_p0 }
  0x90   :  { %v26_v11 = vpop.xlane.xlu0 %25 }
  0x91   :  { %v37_v12 = vmul.f32 0.0625, %v26_v11  ;;  %v32_v13 = vpop.xlane.xlu1 %31 }
  0x92   :  { %v39_v14 = vmul.f32 0.0625, %v32_v13 }
  0x93   :  { %v41_v15 = vsub.f32 %v19_v0, %v37_v12  ;;  %v145_v34 = vmul.f32 %v192_v31, %v37_v12 }
  0x94   :  { %v43_v16 = vsub.f32 %v21_v3, %v39_v14  ;;  %v29_v17 = vpop.xlane.xlu0 %28  ;;  %v147_v32 = vmul.f32 %v192_v31, %v39_v14 }
  0x95   :  { %v38_v18 = vmul.f32 0.0625, %v29_v17  ;;  %v35_v19 = vpop.xlane.xlu1 %34  ;;  %v45_v20 = vmul.f32 %v41_v15, %v41_v15 }
  0x96   :  { %v40_v21 = vmul.f32 0.0625, %v35_v19  ;;  %v47_v22 = vmul.f32 %v43_v16, %v43_v16 }
  0x97   :  { %v42_v23 = vsub.f32 %v20_v6, %v38_v18  ;;  %v49_v24 = vsel %vm23_vm0, %v45_v20, 0.0  ;;  %v146_v40 = vmul.f32 %v192_v31, %v38_v18 }
  0x98   :  { %v44_v25 = vsub.f32 %v22_v4, %v40_v21  ;;  %50 = vadd.xlane.f32.xlu0 %v49_v24  ;;  %v55_v26 = vsel %vm23_vm0, %v47_v22, 0.0  ;;  %v148_v37 = vmul.f32 %v192_v31, %v40_v21 }
  0x99   :  { %v46_v27 = vmul.f32 %v42_v23, %v42_v23 }
  0x9a   :  { %v48_v28 = vmul.f32 %v44_v25, %v44_v25 }
  0x9b   :  { %v52_v29 = vsel %vm23_vm0, %v46_v27, 0.0 }
  0x9c   :  { %56 = vadd.xlane.f32.xlu0 %v55_v26  ;;  %53 = vadd.xlane.f32.xlu1 %v52_v29  ;;  %v58_v30 = vsel %vm23_vm0, %v48_v28, 0.0 }
  0xa0   :  { %59 = vadd.xlane.f32.xlu1 %v58_v30 }
  0xdb   :  { %v201_v33 = vpop.f32.mrb[0].mxu0 }
  0xdc   :  { %v151_v35 = vsub.f32 %v201_v33, %v147_v32  ;;  %v123_v36 = vpop.f32.mrb[1].mxu0 }
  0xdd   :  { %v149_v38 = vsub.f32 %v123_v36, %v145_v34  ;;  %v202_v39 = vpop.f32.mrb[2].mxu0 }
  0xde   :  { %v152_v41 = vsub.f32 %v202_v39, %v148_v37  ;;  %v126_v42 = vpop.f32.mrb[3].mxu0 }
  0xdf   :  { %v150_v43 = vsub.f32 %v126_v42, %v146_v40 }
 0x125   :  { %v51_v44 = vpop.xlane.xlu0 %50 }
 0x126   :  { %v61_v45 = vmul.f32 0.0625, %v51_v44 }
 0x128   :  { %v65_v46 = vadd.f32 1e-05, %v61_v45 }
 0x129   :  { %v54_v47 = vpop.xlane.xlu1 %53  ;;  %v57_v48 = vpop.xlane.xlu0 %56 }
 0x12a   :  { %207 = vrsqrt.f32 %v65_v46  ;;  %v62_v49 = vmul.f32 0.0625, %v54_v47  ;;  %v63_v50 = vmul.f32 0.0625, %v57_v48 }
 0x12c   :  { %v66_v51 = vadd.f32 1e-05, %v62_v49  ;;  %v67_v52 = vadd.f32 1e-05, %v63_v50 }
 0x12d   :  { %v60_v53 = vpop.xlane.xlu1 %59 }
 0x12e   :  { %209 = vrsqrt.f32 %v66_v51  ;;  %v64_v54 = vmul.f32 0.0625, %v60_v53 }
 0x12f   :  { %211 = vrsqrt.f32 %v67_v52 }
 0x130   :  { %v68_v55 = vadd.f32 1e-05, %v64_v54 }
 0x132   :  { %213 = vrsqrt.f32 %v68_v55 }
 0x134   :  { %v208_v56 = vpop.eup %207 }
 0x135   :  { %v153_v58 = vmul.f32 %v208_v56, %v149_v38 }
 0x137   :  { %v164_v59 = vadd.f32 %v193_v57, %v153_v58 }
 0x138   :  { %v210_v60 = vpop.eup %209 }
 0x139   :  { %v212_v61 = vpop.eup %211  ;;  %v154_v62 = vmul.f32 %v210_v60, %v150_v43  ;;  %169 = vst.msk [vmem:[#allocation2] sm:$0xff] %vm168_vm1, %v164_v59 }
 0x13a   :  { %v155_v63 = vmul.f32 %v212_v61, %v151_v35 }
 0x13b   :  { %v165_v0 = vadd.f32 %v193_v57, %v154_v62 }
 0x13c   :  { %v214_v1 = vpop.eup %213  ;;  %v166_v2 = vadd.f32 %v193_v57, %v155_v63 }
 0x13d   :  { %v156_v3 = vmul.f32 %v214_v1, %v152_v41  ;;  %170 = vst.msk [vmem:[#allocation2 + $0x8] sm:$0xff] %vm168_vm1, %v165_v0 }
 0x13e   :  { %171 = vst.msk [vmem:[#allocation2 + $0x10] sm:$0xff] %vm168_vm1, %v166_v2 }
 0x13f   :  { %v167_v4 = vadd.f32 %v193_v57, %v156_v3 }
 0x141   :  { %172 = vst.msk [vmem:[#allocation2 + $0x18] sm:$0xff] %vm168_vm1, %v167_v4 }
 0x142   :  { %226 = shalt.err (!%p223_p4)
}
 0x143   :  { %s227_s30 = scalar_lea.hbm %s318_s4, 512 }
 0x144   :  { %p228_p5 = scmp.ne.s32.totalorder %s318_s4, %s227_s30  ;;  %p231_p6 = scmp.lt.u32.totalorder %s227_s30, %s318_s4 }
 0x146   :  { %p233_p7 = pnand %p231_p6, %p228_p5 }
 0x148   :  { %236 = shalt.err (!%p233_p7)
}
 0x149   :  { %s240_s9 = smov 128   ;;  %s241_s10 = smov 8  }
 0x14a   :  { %184 = dma.vmem_to_hbm [thread:$0]  %s179_s27, 512, %s318_s4, [#allocation3], %s240_s9, %s240_s9, %s241_s10  }
 0x14b   :  { %237 = dma.done.wait [#allocation3], 512  }
 0x14c   :  { %238 = vsyncadd [#allocation3], 4294966784 }
 0x14d   :  { %188 = vsyncpa [#allocation3], 1 }

</bundles_post_ra>
